<compile_context>
chip_gen: v6e
topology: v6e:2x2x1
jax: 0.10.0
libtpu: 0.0.40
codegen_flags: <defaults>
</compile_context>

<pallas_src>
import functools

import jax
import jax.numpy as jnp
from jax.experimental import pallas as pl
from jax.experimental.pallas import tpu as pltpu


def _pick_tile_rows(batch, dim, itemsize, target_block_bytes):
    """Rows per tile: ~target_block_bytes per input block, sublane-aligned."""
    sublane = max(8, 32 // itemsize)           # 8 f32 / 16 bf16 / 32 int8-fp8
    rows = max(1, target_block_bytes // max(1, dim * itemsize))
    rows = min(rows, 32768)                    # keep per-row temporaries sane
    if rows >= batch:
        return batch                           # single tile; full-dim block is always legal
    if rows >= 128:
        rows = (rows // 128) * 128             # multiple of 128 (lane friendly)
    else:
        rows = max(sublane, (rows // sublane) * sublane)
    return min(rows, batch)


def _contrastive_loss_kernel(x1_ref, x2_ref, lbl_ref, out_ref, *,
                             margin, batch, tile_rows):
    # x1_ref, x2_ref: (TB, D) native dtype in VMEM
    # lbl_ref:        (TB, 1) f32 in VMEM
    # out_ref:        (1, TB, 1) f32 per-tile output block
    x1 = x1_ref[...].astype(jnp.float32)
    x2 = x2_ref[...].astype(jnp.float32)
    diff = x1 - x2
    sq_dist = jnp.sum(diff * diff, axis=1, keepdims=True)       # (TB, 1) = d^2
    dist = jnp.sqrt(sq_dist)                                     # (TB, 1) = d
    lbl = lbl_ref[...].astype(jnp.float32)                       # (TB, 1)
    hinge = jnp.maximum(margin - dist, 0.0)
    per_sample = (1.0 - lbl) * sq_dist + lbl * hinge * hinge     # (TB, 1)

    # Mask the ragged batch tail (rows >= B hold undefined data from HBM).
    rid = jax.lax.broadcasted_iota(jnp.int32, (tile_rows, 1), 0)
    row = pl.program_id(0) * tile_rows + rid
    per_sample = jnp.where(row < batch, per_sample, 0.0)

    out_ref[...] = per_sample.reshape(out_ref.shape)


def contrastive_loss(output1, output2, label, *, margin=1.0,
                     target_block_bytes=2 * 1024 * 1024):
    B, D = output1.shape
    itemsize = jnp.dtype(output1.dtype).itemsize

    tb = _pick_tile_rows(B, D, itemsize, target_block_bytes)
    num_tiles = pl.cdiv(B, tb)

    label2d = label.astype(jnp.float32).reshape(B, 1)

    kernel = functools.partial(
        _contrastive_loss_kernel, margin=float(margin), batch=B, tile_rows=tb)

    grid_spec = pltpu.PrefetchScalarGridSpec(
        num_scalar_prefetch=0,
        grid=(num_tiles,),
        in_specs=[
            pl.BlockSpec((tb, D), lambda i: (i, 0)),   # true D: no column pad
            pl.BlockSpec((tb, D), lambda i: (i, 0)),
            pl.BlockSpec((tb, 1), lambda i: (i, 0)),
        ],
        out_specs=pl.BlockSpec((1, tb, 1), lambda i: (i, 0, 0)),
    )

    cost = pl.CostEstimate(
        flops=int(4 * B * D + 8 * B),
        transcendentals=int(B),
        bytes_accessed=int(2 * B * D * itemsize + 4 * B + 4 * num_tiles * tb),
    )

    per_row = pl.pallas_call(
        kernel,
        out_shape=jax.ShapeDtypeStruct((num_tiles, tb, 1), jnp.float32),
        grid_spec=grid_spec,
        compiler_params=pltpu.CompilerParams(
            dimension_semantics=("parallel",)),
        cost_estimate=cost,
    )(output1, output2, label2d)

    # Tail rows are masked to exactly 0 inside the kernel, so a plain sum over
    # all per-tile blocks equals the sum over the true B samples.
    return jnp.sum(per_row) / B


def _reference(output1, output2, label, margin=1.0):
    d = jnp.sqrt(jnp.sum((output1.astype(jnp.float32)
                          - output2.astype(jnp.float32)) ** 2, axis=1))
    return jnp.mean((1.0 - label) * d ** 2
                    + label * jnp.clip(margin - d, 0.0, None) ** 2)


if __name__ == "__main__":
    key = jax.random.PRNGKey(0)

    def _check(B, D, dtype, margin, target_bytes, rtol, atol):
        k1, k2, k3 = jax.random.split(jax.random.fold_in(key, B * 1000 + D), 3)
        o1 = jax.random.normal(k1, (B, D), dtype=jnp.float32).astype(dtype)
        o2 = jax.random.normal(k2, (B, D), dtype=jnp.float32).astype(dtype)
        lbl = jax.random.bernoulli(k3, 0.5, (B,)).astype(jnp.float32)
        loss = contrastive_loss(o1, o2, lbl, margin=margin,
                                target_block_bytes=target_bytes)
        jax.block_until_ready(loss)
        ref = _reference(o1, o2, lbl, margin=margin)
        assert jnp.allclose(loss, ref, rtol=rtol, atol=atol), (B, D, dtype, loss, ref)

    # Small shape implied by the module (single full-dim tile path).
    _check(8, 32, jnp.float32, 1.0, 2 * 1024 * 1024, 1e-5, 1e-5)
    # Multi-tile path with a ragged batch tail (masked in-kernel, no padding).
    _check(300, 64, jnp.float32, 1.0, 32 * 1024, 1e-5, 1e-5)
    # bf16 inputs: native-dtype HBM streaming, upcast in-kernel, 16-row sublane.
    _check(300, 64, jnp.bfloat16, 1.0, 32 * 1024, 2e-2, 2e-2)

    print("KERNEL_OK")
</pallas_src>

<mosaic_0001>
module attributes {stable_mosaic.version = 11 : i64} {
  func.func @_contrastive_loss_kernel(%arg0: i32, %arg1: memref<8x32xf32, #tpu.memory_space<vmem>>, %arg2: memref<8x32xf32, #tpu.memory_space<vmem>>, %arg3: memref<8x1xf32, #tpu.memory_space<vmem>>, %arg4: memref<1x8x1xf32, #tpu.memory_space<vmem>>) attributes {dimension_semantics = [#tpu.dimension_semantics<parallel>], iteration_bounds = array<i64: 1>, scalar_prefetch = 0 : i64, scratch_operands = 0 : i64, tpu.core_type = #tpu.core_type<tc>, window_params = [{transform_indices = @transform_0, window_bounds = array<i64: 8, 32>}, {transform_indices = @transform_1, window_bounds = array<i64: 8, 32>}, {transform_indices = @transform_2, window_bounds = array<i64: 8, 1>}, {transform_indices = @transform_3, window_bounds = array<i64: 1, 8, 1>}]} {
    %c0 = arith.constant 0 : index
    %c0_0 = arith.constant 0 : index
    %0 = vector.load %arg1[%c0, %c0_0] : memref<8x32xf32, #tpu.memory_space<vmem>>, vector<8x32xf32>
    %c0_1 = arith.constant 0 : index
    %c0_2 = arith.constant 0 : index
    %1 = vector.load %arg2[%c0_1, %c0_2] : memref<8x32xf32, #tpu.memory_space<vmem>>, vector<8x32xf32>
    %2 = arith.subf %0, %1 : vector<8x32xf32>
    %3 = arith.mulf %2, %2 : vector<8x32xf32>
    %cst = arith.constant dense<0.000000e+00> : vector<8xf32>
    %4 = vector.multi_reduction <add>, %3, %cst [1] : vector<8x32xf32> to vector<8xf32>
    %5 = vector.shape_cast %4 : vector<8xf32> to vector<8x1xf32>
    %6 = math.sqrt %5 : vector<8x1xf32>
    %c0_3 = arith.constant 0 : index
    %c0_4 = arith.constant 0 : index
    %7 = vector.load %arg3[%c0_3, %c0_4] : memref<8x1xf32, #tpu.memory_space<vmem>>, vector<8x1xf32>
    %cst_5 = arith.constant 1.000000e+00 : f32
    %8 = vector.broadcast %cst_5 : f32 to vector<8x1xf32>
    %9 = arith.subf %8, %6 : vector<8x1xf32>
    %cst_6 = arith.constant 0.000000e+00 : f32
    %10 = vector.broadcast %cst_6 : f32 to vector<8x1xf32>
    %11 = arith.maximumf %9, %10 : vector<8x1xf32>
    %cst_7 = arith.constant 1.000000e+00 : f32
    %12 = vector.broadcast %cst_7 : f32 to vector<8x1xf32>
    %13 = arith.subf %12, %7 : vector<8x1xf32>
    %14 = arith.mulf %13, %5 : vector<8x1xf32>
    %15 = arith.mulf %7, %11 : vector<8x1xf32>
    %16 = arith.mulf %15, %11 : vector<8x1xf32>
    %17 = arith.addf %14, %16 : vector<8x1xf32>
    %18 = tpu.iota {dimensions = array<i32: 0>} : vector<8x1xi32>
    %c8_i32 = arith.constant 8 : i32
    %19 = arith.muli %arg0, %c8_i32 : i32
    %20 = vector.broadcast %19 : i32 to vector<8x1xi32>
    %21 = arith.addi %20, %18 : vector<8x1xi32>
    %c8_i32_8 = arith.constant 8 : i32
    %22 = vector.broadcast %c8_i32_8 : i32 to vector<8x1xi32>
    %23 = arith.cmpi slt, %21, %22 : vector<8x1xi32>
    %cst_9 = arith.constant 0.000000e+00 : f32
    %24 = vector.broadcast %cst_9 : f32 to vector<8x1xf32>
    %25 = arith.select %23, %17, %24 : vector<8x1xi1>, vector<8x1xf32>
    %26 = vector.shape_cast %25 : vector<8x1xf32> to vector<1x8x1xf32>
    %c0_10 = arith.constant 0 : index
    %c0_11 = arith.constant 0 : index
    %c0_12 = arith.constant 0 : index
    %27 = vector.load %arg4[%c0_10, %c0_11, %c0_12] : memref<1x8x1xf32, #tpu.memory_space<vmem>>, vector<1x8x1xf32>
    tpu.vector_store %arg4[%c0_10, %c0_11, %c0_12], %26 {strides = array<i32>} : memref<1x8x1xf32, #tpu.memory_space<vmem>>, vector<1x8x1xf32>,
    return
  }
  func.func @transform_0(%arg0: i32) -> (i32, i32) {
    %c0_i32 = arith.constant 0 : i32
    %c0_i32_0 = arith.constant 0 : i32
    return %arg0, %c0_i32 : i32, i32
  }
  func.func @transform_1(%arg0: i32) -> (i32, i32) {
    %c0_i32 = arith.constant 0 : i32
    %c0_i32_0 = arith.constant 0 : i32
    return %arg0, %c0_i32 : i32, i32
  }
  func.func @transform_2(%arg0: i32) -> (i32, i32) {
    %c0_i32 = arith.constant 0 : i32
    %c0_i32_0 = arith.constant 0 : i32
    return %arg0, %c0_i32 : i32, i32
  }
  func.func @transform_3(%arg0: i32) -> (i32, i32, i32) {
    %c0_i32 = arith.constant 0 : i32
    %c0_i32_0 = arith.constant 0 : i32
    %c0_i32_1 = arith.constant 0 : i32
    return %arg0, %c0_i32, %c0_i32_0 : i32, i32, i32
  }
}

</mosaic_0001>

<bundles_post_ra>
// kernel: tpu_custom_call.1
= control target key start
LH: loop header
LB: loop body
LE: loop exit
PB: predicated region body
PF: predicated region fallthrough
CT: control target
= control target key end

     0   :  { %8 = vsyncpa [#allocation3], 0  ;;  %s88_s12 = smov [#allocation2]   ;;  %s121_s0 = inlined_call_operand.vmem [shape: f32[8,32], index: 0, kind: input, shape index: {}]   ;;  %s122_s1 = inlined_call_operand.hbm [shape: f32[8,32], index: 1, kind: input, shape index: {}]   ;;  %s123_s2 = inlined_call_operand.vmem [shape: f32[8,1], index: 2, kind: input, shape index: {}]   ;;  %s124_s3 = inlined_call_operand.vmem [shape: f32[1,8,1], index: 3, kind: output, shape index: {}]  }
   0x1   :  { %s17_s13 = sshll.u32 %s88_s12, 4  ;;  %s18_s13 = int_to_ptr.vmem [resolvable:$true] %s17_s13 }
   0x2   :  { %s74_s14 = scalar_lea.vmem %s18_s13, 128  ;;  %p79_p1 = scmp.lt.s32.totalorder %s18_s13, %s18_s13 }
   0x3   :  { %p75_p0 = scmp.ne.s32.totalorder %s18_s13, %s74_s14  ;;  %p80_p2 = scmp.lt.s32.totalorder %s74_s14, %s74_s14 }
   0x5   :  { %p81_p3 = por %p80_p2, %p79_p1 }
   0x7   :  { %p82_p4 = pnand %p81_p3, %p75_p0 }
   0x9   :  { %85 = shalt.err (!%p82_p4)
}
   0xa   :  { %20 = dma.hbm_to_vmem [thread:$0]  %s122_s1, 128, %s18_s13, [#allocation3]  }
   0xb   :  { %86 = dma.done.wait [#allocation3], 128  }
   0xc   :  { %87 = vsyncadd [#allocation3], 4294967168  ;;  %v26_v0 = vld [vmem:[%s121_s0] sm:$0xff]  ;;  %vm30_vm0 = vcmask 261120   ;;  %vm56_vm3 = vcmask 7168  }
   0xd   :  { %v27_v1 = vld [vmem:[#allocation2] sm:$0xff] }
   0xe   :  { %v28_v2 = vsub.f32 %v26_v0, %v27_v1  ;;  %v41_v11 = vld [vmem:[%s123_s2] sm:$0xff] }
   0xf   :  { %v44_v14 = vsub.f32 1.0, %v41_v11 }
  0x10   :  { %v29_v3 = vmul.f32 %v28_v2, %v28_v2 }
  0x12   :  { %v31_v4 = vsel %vm30_vm0, %v29_v3, 0.0 }
  0x13   :  { %32 = vadd.xlane.f32.xlu0 %v31_v4 }
  0x9c   :  { %v33_v5 = vpop.xlane.xlu0 %32 }
  0x9d   :  { %64 = vrsqrt.f32 %v33_v5  ;;  %vm36_vm1 = vcmp.eq.f32.partialorder %v33_v5, inf  ;;  %v39_v8 = vand.u32 2147483648, %v33_v5  ;;  %vm38_vm2 = vcmp.eq.f32.partialorder %v33_v5, 0.0 }
  0x9e   :  { %v45_v16 = vmul.f32 %v44_v14, %v33_v5 }
  0xaa   :  { %v65_v6 = vpop.eup %64 }
  0xab   :  { %v35_v7 = vmul.f32 %v65_v6, %v33_v5 }
  0xad   :  { %v37_v9 = vsel %vm36_vm1, %v33_v5, %v35_v7 }
  0xae   :  { %v40_v10 = vsel %vm38_vm2, %v39_v8, %v37_v9 }
  0xaf   :  { %v42_v12 = vsub.f32 1.0, %v40_v10 }
  0xb1   :  { %v43_v13 = vmax.f32 %v42_v12, 0.0 }
  0xb3   :  { %v46_v15 = vmul.f32 %v43_v13, %v41_v11 }
  0xb5   :  { %v47_v17 = vmul.f32 %v46_v15, %v43_v13 }
  0xb7   :  { %v48_v18 = vadd.f32 %v47_v17, %v45_v16 }
  0xb9   :  { %57 = vst.msk [vmem:[%s124_s3] sm:$0xff] %vm56_vm3, %v48_v18 }
  0xba   :  { %62 = vsyncpa [#allocation3], 1 }

</bundles_post_ra>
